<compile_context>
chip_gen: v6e
topology: v6e:2x2x1
jax: 0.10.0
libtpu: 0.0.40
codegen_flags: <defaults>
</compile_context>

<pallas_src>
import jax
import jax.numpy as jnp
from jax import lax
from jax.experimental import pallas as pl
from jax.experimental.pallas import tpu as pltpu


# ---------------------------------------------------------------------------
# Kernels
# ---------------------------------------------------------------------------

def _pe_kernel_split(idxs_ref, inv_ref, out_ref):
    """Used when (n_emb // 2) % 128 == 0: both half-stores are lane-aligned.

    idxs_ref: (tR, 1) int/float   positions (cast to f32 in-kernel)
    inv_ref:  (1, half) f32       inverse frequencies
    out_ref:  (tR, n_emb)         output tile
    """
    pos = idxs_ref[...].astype(jnp.float32)      # (tR, 1)
    inv = inv_ref[...]                           # (1, half)
    half = inv.shape[1]
    x = pos * inv                                # (tR, half), broadcast, no relayout
    out_ref[:, :half] = jnp.sin(x).astype(out_ref.dtype)
    out_ref[:, half:] = jnp.cos(x).astype(out_ref.dtype)


def _pe_kernel_select(idxs_ref, inv_full_ref, out_ref):
    """Used when (n_emb // 2) % 128 != 0: one full-width lane-dense store.

    idxs_ref:     (tR, 1)         positions
    inv_full_ref: (1, n_emb) f32  inv_freq tiled twice
    out_ref:      (tR, n_emb)
    """
    pos = idxs_ref[...].astype(jnp.float32)      # (tR, 1)
    inv_full = inv_full_ref[...]                 # (1, n_emb)
    n_emb = inv_full.shape[1]
    half = n_emb // 2
    x = pos * inv_full                           # (tR, n_emb)
    lane = lax.broadcasted_iota(jnp.int32, x.shape, 1)
    # Same sin/cos values as the torch module; only the assembly differs.
    out = jnp.where(lane < half, jnp.sin(x), jnp.cos(x))
    out_ref[...] = out.astype(out_ref.dtype)


# ---------------------------------------------------------------------------
# Tiling heuristics
# ---------------------------------------------------------------------------

def _round_up(x: int, m: int) -> int:
    return ((x + m - 1) // m) * m


def _vmem_budget_bytes():
    """(tile budget, scoped vmem limit) — conservative for v7x, larger on v5e/v6e."""
    budget, limit = 16 * 1024 * 1024, 32 * 1024 * 1024
    try:
        if pltpu.get_tpu_info().vmem_capacity_bytes >= 100 * 1024 * 1024:
            budget, limit = 32 * 1024 * 1024, 64 * 1024 * 1024
    except Exception:
        pass
    return budget, limit


def _pick_tile_rows(rows: int, n_emb: int, budget_bytes: int) -> int:
    # Double-buffered pipeline: output tile (tR, n_emb) f32 + idxs tile (tR, 1)
    # which pads to (tR, 128) lanes in VMEM.
    per_row_bytes = 4 * (n_emb + 128)
    t_r = max(8, budget_bytes // (2 * per_row_bytes))
    t_r = min(t_r, 2048)               # diminishing returns past ~1-2K rows/step
    t_r = (t_r // 8) * 8
    if rows <= t_r:
        # Ensure >= 2 grid steps so both v7x TensorCores get work.
        t_r = _round_up((rows + 1) // 2, 8) if rows > 8 else 8
    else:
        # Rebalance: same number of blocks, minimal ragged-edge waste.
        n_blocks = -(-rows // t_r)
        t_r = min(t_r, _round_up(-(-rows // n_blocks), 8))
    return max(8, t_r)


# ---------------------------------------------------------------------------
# Wrapper
# ---------------------------------------------------------------------------

def sincos_positional_encoding(
    idxs: jax.Array,
    n_emb: int,
    *,
    out_dtype=jnp.float32,
    min_pallas_bytes: int = 1 << 20,
    force_pallas: bool = False,
) -> jax.Array:
    """idxs: (B, S) -> (B, 1, S, n_emb), matching the PyTorch module forward."""
    assert n_emb % 2 == 0, "n_emb must be even"
    B, S = idxs.shape
    half = n_emb // 2
    rows = B * S

    # Deterministic "buffer" init, same formula as the module __init__.
    inv_freq = 1.0 / (10000.0 ** (jnp.arange(0, n_emb, 2, dtype=jnp.float32) / n_emb))

    out_bytes = rows * n_emb * jnp.dtype(out_dtype).itemsize
    if (not force_pallas) and out_bytes < min_pallas_bytes:
        # Small-problem fallback: XLA fusion beats pallas_call fixed overhead here.
        sin_inp = jnp.einsum("bi,j->bij", idxs.astype(jnp.float32), inv_freq)
        emb = jnp.concatenate([jnp.sin(sin_inp), jnp.cos(sin_inp)], axis=-1)
        return emb[:, None].astype(out_dtype)

    budget, vmem_limit = _vmem_budget_bytes()
    t_r = _pick_tile_rows(rows, n_emb, budget)
    n_blocks = pl.cdiv(rows, t_r)
    rows_pad = n_blocks * t_r

    # Positions: flattened, sublane-major (rows, 1); pad only this tiny input.
    idxs_flat = idxs.reshape(rows, 1)
    if rows_pad != rows:
        idxs_flat = jnp.pad(idxs_flat, ((0, rows_pad - rows), (0, 0)))

    if half % 128 == 0:
        kernel = _pe_kernel_split
        inv_arr = inv_freq.reshape(1, half)
    else:
        kernel = _pe_kernel_select
        inv_arr = jnp.concatenate([inv_freq, inv_freq]).reshape(1, n_emb)
    inv_w = inv_arr.shape[1]

    out = pl.pallas_call(
        kernel,
        out_shape=jax.ShapeDtypeStruct((rows, n_emb), out_dtype),
        grid_spec=pltpu.PrefetchScalarGridSpec(
            num_scalar_prefetch=0,
            grid=(n_blocks,),
            in_specs=[
                pl.BlockSpec((t_r, 1), lambda r: (r, 0)),
                pl.BlockSpec((1, inv_w), lambda r: (0, 0)),
            ],
            out_specs=pl.BlockSpec((t_r, n_emb), lambda r: (r, 0)),
        ),
        compiler_params=pltpu.CompilerParams(
            dimension_semantics=("parallel",),
            vmem_limit_bytes=vmem_limit,
        ),
    )(idxs_flat, inv_arr)

    # (rows, n_emb) -> (B, 1, S, n_emb): row-major-compatible reshape (free).
    return out.reshape(B, 1, S, n_emb)


# ---------------------------------------------------------------------------
# Reference + tests
# ---------------------------------------------------------------------------

def _reference(idxs: jax.Array, n_emb: int) -> jax.Array:
    inv_freq = 1.0 / (10000.0 ** (jnp.arange(0, n_emb, 2, dtype=jnp.float32) / n_emb))
    sin_inp = jnp.einsum("bi,j->bij", idxs.astype(jnp.float32), inv_freq)
    emb = jnp.concatenate([jnp.sin(sin_inp), jnp.cos(sin_inp)], axis=-1)
    return emb[:, None]


if __name__ == "__main__":
    key = jax.random.PRNGKey(0)
    k1, k2 = jax.random.split(key, 2)

    # Case 1: module-spec small shapes (B=2, S=8, n_emb=32) -> jnp fallback path.
    B, S, n_emb = 2, 8, 32
    idxs = jax.random.randint(k1, (B, S), 0, 100, dtype=jnp.int32)
    out = jax.block_until_ready(sincos_positional_encoding(idxs, n_emb))
    ref = _reference(idxs, n_emb)
    assert out.shape == (B, 1, S, n_emb), out.shape
    assert jnp.allclose(out, ref, atol=1e-5, rtol=1e-5), "mismatch (small/fallback)"

    # Case 2: same small shapes forced through the Pallas kernel — exercises the
    # lane-select kernel (half % 128 != 0) and a multi-block grid.
    out_p = jax.block_until_ready(
        sincos_positional_encoding(idxs, n_emb, force_pallas=True))
    assert out_p.shape == (B, 1, S, n_emb), out_p.shape
    assert jnp.allclose(out_p, ref, atol=1e-5, rtol=1e-5), "mismatch (small/pallas)"

    # Case 3: above fallback threshold — split-store kernel (n_emb multiple of
    # 256), ragged last block (rows not a multiple of the row tile).
    B2, S2, n_emb2 = 4, 600, 256
    idxs2 = jax.random.randint(k2, (B2, S2), 0, 10000, dtype=jnp.int32)
    out2 = jax.block_until_ready(sincos_positional_encoding(idxs2, n_emb2))
    ref2 = _reference(idxs2, n_emb2)
    assert out2.shape == (B2, 1, S2, n_emb2), out2.shape
    assert jnp.allclose(out2, ref2, atol=1e-5, rtol=1e-5), "mismatch (large/pallas)"

    print("KERNEL_OK")
</pallas_src>

<mosaic_0001>
module attributes {stable_mosaic.version = 11 : i64} {
  func.func @_pe_kernel_select(%arg0: i32, %arg1: memref<8x1xi32, #tpu.memory_space<vmem>>, %arg2: memref<1x32xf32, #tpu.memory_space<vmem>>, %arg3: memref<8x32xf32, #tpu.memory_space<vmem>>) attributes {dimension_semantics = [#tpu.dimension_semantics<parallel>], iteration_bounds = array<i64: 2>, scalar_prefetch = 0 : i64, scratch_operands = 0 : i64, tpu.core_type = #tpu.core_type<tc>, window_params = [{transform_indices = @transform_0, window_bounds = array<i64: 8, 1>}, {pipeline_mode = #tpu.pipeline_mode<synchronous>, transform_indices = @transform_1, window_bounds = array<i64: 1, 32>}, {transform_indices = @transform_2, window_bounds = array<i64: 8, 32>}]} {
    %c0 = arith.constant 0 : index
    %c0_0 = arith.constant 0 : index
    %0 = vector.load %arg1[%c0, %c0_0] : memref<8x1xi32, #tpu.memory_space<vmem>>, vector<8x1xi32>
    %1 = arith.sitofp %0 : vector<8x1xi32> to vector<8x1xf32>
    %c0_1 = arith.constant 0 : index
    %c0_2 = arith.constant 0 : index
    %2 = vector.load %arg2[%c0_1, %c0_2] : memref<1x32xf32, #tpu.memory_space<vmem>>, vector<1x32xf32>
    %3 = vector.broadcast %1 : vector<8x1xf32> to vector<8x32xf32>
    %4 = vector.broadcast %2 : vector<1x32xf32> to vector<8x32xf32>
    %5 = arith.mulf %3, %4 : vector<8x32xf32>
    %6 = tpu.iota {dimensions = array<i32: 1>} : vector<8x32xi32>
    %c16_i32 = arith.constant 16 : i32
    %7 = vector.broadcast %c16_i32 : i32 to vector<8x32xi32>
    %8 = arith.cmpi slt, %6, %7 : vector<8x32xi32>
    %9 = math.sin %5 : vector<8x32xf32>
    %10 = math.cos %5 : vector<8x32xf32>
    %11 = arith.select %8, %9, %10 : vector<8x32xi1>, vector<8x32xf32>
    %c0_3 = arith.constant 0 : index
    %c0_4 = arith.constant 0 : index
    %12 = vector.load %arg3[%c0_3, %c0_4] : memref<8x32xf32, #tpu.memory_space<vmem>>, vector<8x32xf32>
    tpu.vector_store %arg3[%c0_3, %c0_4], %11 {strides = array<i32>} : memref<8x32xf32, #tpu.memory_space<vmem>>, vector<8x32xf32>,
    return
  }
  func.func @transform_0(%arg0: i32) -> (i32, i32) {
    %c0_i32 = arith.constant 0 : i32
    %c0_i32_0 = arith.constant 0 : i32
    return %arg0, %c0_i32 : i32, i32
  }
  func.func @transform_1(%arg0: i32) -> (i32, i32) {
    %c0_i32 = arith.constant 0 : i32
    %c0_i32_0 = arith.constant 0 : i32
    %c0_i32_1 = arith.constant 0 : i32
    return %c0_i32, %c0_i32_0 : i32, i32
  }
  func.func @transform_2(%arg0: i32) -> (i32, i32) {
    %c0_i32 = arith.constant 0 : i32
    %c0_i32_0 = arith.constant 0 : i32
    return %arg0, %c0_i32 : i32, i32
  }
}

</mosaic_0001>

<bundles_post_ra>
// kernel: tpu_custom_call.1
= control target key start
LH: loop header
LB: loop body
LE: loop exit
PB: predicated region body
PF: predicated region fallthrough
CT: control target
= control target key end

     0   :  { %7 = vsyncpa [#allocation3], 0  ;;  %s724_s0 = inlined_call_operand.vmem [shape: s32[16,1], index: 0, kind: input, shape index: {}]   ;;  %s725_s1 = inlined_call_operand.vmem [shape: f32[1,32], index: 1, kind: input, shape index: {}]   ;;  %s726_s2 = inlined_call_operand.hbm [shape: f32[16,32], index: 2, kind: output, shape index: {}]  }
   0x1   :  { %9 = vsyncpa [#allocation3 + $0x1], 0  ;;  %s599_s9 = smov 0   ;;  %s601_s10 = smov 0  }
   0x2   :  { %s603_s11 = smov 0   ;;  %s605_s12 = smov 0  }
   0x3 LB: > { %s620_s13 = sadd.s32 4294967295, %s574_s12   ;;  %s440_s14 = sadd.s32 4294967294, %s574_s12   ;;  %s574_s12 = sphi %s605_s12, %s732_s12   ;;  %s570_s11 = sphi %s603_s11, %s731_s11   ;;  %s566_s10 = sphi %s601_s10, %s730_s10   ;;  %s562_s9 = sphi %s599_s9, %s729_s9  }
   0x4   : > { %s624_s15 = sadd.s32 1, %s574_s12   ;;  %s69_s16 = sadd.s32 1, %s570_s11 }
   0x5   : > { %s66_s17 = ssub.s32 %s574_s12, %s624_s15  ;;  %p79_p0 = scmp.ne.s32.totalorder %s570_s11, %s566_s10 }
   0x6   : > { %p67_p1 = scmp.eq.s32.totalorder %s66_s17, 0  ;;  %p80_p2 = scmp.eq.s32.totalorder %s620_s13, 1 }
   0x7   : > { %p85_p3 = scmp.ne.s32.totalorder %s566_s10, %s562_s9  ;;  %p86_p4 = scmp.eq.s32.totalorder %s440_s14, 1 }
   0x8   : > { %s635_s18 = scalar_select %p67_p1, %s570_s11, %s69_s16  }
   0x9   : > { %p637_p5 = por %p80_p2, %p79_p0  ;;  %p641_p6 = por %p86_p4, %p85_p3 }
   0xa   : > { %p443_p7 = scmp.ge.s32.totalorder %s574_s12, 1  ;;  %p114_p8 = scmp.lt.s32.totalorder %s574_s12, 3 }
   0xc   : > { %p115_p9 = pnand %p443_p7, %p114_p8 }
   0xd   : > { %p135_p10 = scmp.lt.s32.totalorder (!%p115_p9), %s620_s13, 1  ;;  %s132_s28 = sand.u32 (!%p115_p9), 1, %s566_s10  }
   0xe   : > { %118 = sbr.rel (%p115_p9) target bundleno = 248 (0xf8), region = 28  ;;  %s678_s29 = sshll.u32 (!%p115_p9), %s132_s28, 3 }
   0xf   : > { %s456_s30 = sshll.u32 (!%p115_p9), %s620_s13, 7  ;;  %s134_s3 = scalar_lea.vmem (!%p115_p9), [#allocation2], %s678_s29 }
  0x10   : > { %s381_s4 = sshll.u32 (!%p115_p9), %s134_s3, 4  ;;  %s686_s7 = scalar_lea.hbm (!%p115_p9), %s726_s2, %s456_s30  ;;  %s382_s4 = int_to_ptr.vmem [resolvable:$true] %s381_s4 }
  0x11   : > { %s368_s8 = scalar_lea.sflag (!%p115_p9), [#allocation3], %s132_s28  ;;  %s583_s14 = smov (!%p115_p9), [#allocation2]  }
  0x12   : > { %s518_s16 = sshll.u32 (!%p115_p9), %s583_s14, 4  ;;  %s519_s16 = int_to_ptr.vmem [resolvable:$false] %s518_s16 }
  0x13   : > { %v576_v0 = vmov 0   ;;  %s136_s21 = scalar_select %p135_p10, %s620_s13, 1  ;;  %v446_v3 = vld [vmem:[%s725_s1] ss:$0 sm:$0xff]  ;;  %v577_v16 = vmov 683565275  }
  0x14   : > { %509 = vset.pattern.permute.xlu0 %v576_v0  ;;  %v578_v18 = vmov 2475754826   ;;  %v579_v21 = vmov 2131351028   ;;  %v580_v24 = vmov 2102212464   ;;  %p521_p0 = scmp.lt.s32.totalorder %s382_s4, %s519_s16 }
  0x15   : > { %s445_s22 = sshll.u32 %s136_s21, 3  ;;  %v581_v27 = vmov 920167782   ;;  %v582_v30 = vmov 1326507024   ;;  %s514_s13 = scalar_lea.vmem %s382_s4, 128 }
  0x16   : > { %s138_s25 = scalar_lea.vmem %s724_s0, %s445_s22  ;;  %p515_p11 = scmp.ne.s32.totalorder %s382_s4, %s514_s13 }
  0x17   : > { %v139_v1 = vld [vmem:[%s138_s25] sm:$0xff]  ;;  %s520_s17 = scalar_lea.vmem %s519_s16, 256 }
  0x18   : > { %v140_v2 = vcvt.s32.f32 %v139_v1  ;;  %p516_p12 = pnand %p515_p11, %p637_p5  ;;  %p522_p1 = scmp.lt.s32.totalorder %s520_s17, %s514_s13 }
  0x1a   : > { %144 = vperm.xlu0 %509, %v140_v2   ;;  %p517_p13 = pneg %p516_p12  ;;  %p523_p2 = por %p522_p1, %p521_p0 }
  0x1c   : > { %p524_p3 = pnand %p523_p2, %p517_p13 }
  0x95   : > { %v145_v4 = vpop.permute.xlu0 %144 }
  0x96   : > { %v655_v5 = vmul.f32 %v446_v3, %v145_v4 }
  0x98   : > { %v160_v6 = vand.u32 2139095040, %v655_v5  ;;  %v157_v10 = vand.u32 2147483647, %v655_v5  ;;  %vm159_vm7 = vcmp.lt.s32.totalorder %v655_v5, 0 }
  0x9a   : > { %v161_v7 = vshrl.u32 %v160_v6, 23  ;;  %v164_v13 = vand.u32 8388607, %v157_v10  ;;  %vm158_vm8 = vcmp.le.f32.partialorder %v157_v10, 0.7853982 }
  0x9c   : > { %v447_v8 = vadd.s32 4294967169, %v161_v7  ;;  %v165_v32 = vor.u32 8388608, %v164_v13 }
  0x9e   : > { %v167_v9 = vadd.s32 1, %v447_v8  ;;  %v205_v46 = vshll.u32 %v165_v32, 8 }
  0xa0   : > { %vm168_vm0 = vcmp.gt.s32.totalorder %v167_v9, 0 }
  0xa1   : > { %v169_v11 = vsel %vm168_vm0, %v167_v9, 0  ;;  %vm249_vm0 = vweird.f32 %v655_v5 }
  0xa2   : > { %v171_v12 = vand.u32 31, %v169_v11  ;;  %v170_v15 = vshrl.u32 %v169_v11, 5 }
  0xa4   : > { %v172_v14 = vsub.s32 32, %v171_v12  ;;  %v174_v17 = vshll.u32 %v577_v16, %v171_v12  ;;  %v177_v19 = vshll.u32 %v578_v18, %v171_v12  ;;  %v180_v23 = vshll.u32 %v579_v21, %v171_v12 }
  0xa5   : > { %v183_v26 = vshll.u32 %v580_v24, %v171_v12  ;;  %v186_v29 = vshll.u32 %v581_v27, %v171_v12  ;;  %vm189_vm1 = vcmp.lt.s32.totalorder %v170_v15, 1  ;;  %vm192_vm2 = vcmp.lt.s32.totalorder %v170_v15, 4 }
  0xa6   : > { %v175_v20 = vshrl.u32 %v578_v18, %v172_v14  ;;  %v178_v22 = vshrl.u32 %v579_v21, %v172_v14  ;;  %v181_v25 = vshrl.u32 %v580_v24, %v172_v14  ;;  %v184_v28 = vshrl.u32 %v581_v27, %v172_v14 }
  0xa7   : > { %v187_v31 = vshrl.u32 %v582_v30, %v172_v14  ;;  %v173_v41 = vshrl.u32 %v577_v16, %v172_v14  ;;  %vm191_vm3 = vcmp.lt.s32.totalorder %v170_v15, 3  ;;  %vm190_vm4 = vcmp.lt.s32.totalorder %v170_v15, 2 }
  0xa8   : > { %v176_v33 = vor.u32 %v175_v20, %v174_v17  ;;  %v179_v34 = vor.u32 %v178_v22, %v177_v19  ;;  %v182_v35 = vor.u32 %v181_v25, %v180_v23  ;;  %v185_v36 = vor.u32 %v184_v28, %v183_v26 }
  0xa9   : > { %v188_v37 = vor.u32 %v187_v31, %v186_v29  ;;  %v154_v25 = vlaneseq }
  0xaa   : > { %v194_v38 = vsel %vm192_vm2, %v182_v35, 2102212464  ;;  %v197_v39 = vsel %vm189_vm1, %v176_v33, %v179_v34  ;;  %v201_v40 = vsel %vm189_vm1, %v179_v34, %v182_v35  ;;  %v198_v42 = vsel %vm192_vm2, %v185_v36, 920167782 }
  0xab   : > { %v202_v43 = vsel %vm192_vm2, %v188_v37, 1326507024  ;;  %v199_v44 = vsel %vm191_vm3, %v182_v35, %v198_v42  ;;  %v193_v47 = vsel %vm189_vm1, %v173_v41, %v176_v33  ;;  %v195_v48 = vsel %vm191_vm3, %v179_v34, %v194_v38 }
  0xac   : > { %v203_v45 = vsel %vm191_vm3, %v185_v36, %v202_v43  ;;  %v200_v49 = vsel %vm190_vm4, %v197_v39, %v199_v44  ;;  %v196_v55 = vsel %vm190_vm4, %v193_v47, %v195_v48  ;;  %v155_v27 = vand.u32 127, %v154_v25 }
  0xad   : > { %v204_v50 = vsel %vm190_vm4, %v201_v40, %v203_v45  ;;  %v664_v53 = vmul.u32.u64.low %v205_v46, %v200_v49  ;;  %v665_v54 = vmul.u32.u64.high %v205_v46, %v200_v49, %v664_v53  ;;  %v212_v57 = vmul.u32 %v205_v46, %v196_v55 }
  0xae   : > { %v661_v51 = vmul.u32.u64.low %v205_v46, %v204_v50  ;;  %v662_v52 = vmul.u32.u64.high %v205_v46, %v204_v50, %v661_v51  ;;  %vm156_vm9 = vcmp.lt.s32.totalorder %v155_v27, 16  ;;  %vm365_vm1 = vcmask 261120  }
  0xaf   : > { %v215_v56 = vadd.s32 1, %v665_v54 }
  0xb0   : > { %vm214_vm5 = vc.u32 %v662_v52, %v664_v53  ;;  %v213_v6 = vadd.s32 %v664_v53, %v662_v52 }
  0xb1   : > { %v216_v58 = vsel %vm214_vm5, %v215_v56, %v665_v54 }
  0xb2   : > { %v217_v59 = vadd.s32 %v216_v58, %v212_v57 }
  0xb4   : > { %v218_v60 = vadd.s32 536870912, %v217_v59 }
  0xb6   : > { %v219_v61 = vshrl.u32 %v218_v60, 30 }
  0xb8   : > { %v220_v62 = vshll.u32 %v219_v61, 30  ;;  %v243_v20 = vsub.s32 4, %v219_v61 }
  0xba   : > { %v221_v63 = vsub.s32 %v217_v59, %v220_v62  ;;  %v244_v23 = vsel %vm159_vm7, %v243_v20, %v219_v61 }
  0xbb   : > { %v246_v24 = vsel %vm158_vm8, 0, %v244_v23 }
  0xbc   : > { %v223_v0 = vsub.s32 0, %v221_v63  ;;  %v250_v26 = vadd.s32 3, %v246_v24  ;;  %v354_v29 = vand.u32 3, %v246_v24 }
  0xbe   : > { %v448_v1 = vmin.u32 %v223_v0, %v221_v63  ;;  %v251_v28 = vand.u32 3, %v250_v26  ;;  %vm359_vm11 = vcmp.eq.s32.totalorder %v354_v29, 2  ;;  %vm356_vm13 = vcmp.eq.s32.totalorder %v354_v29, 0 }
  0xbf   : > { %vm355_vm15 = vcmp.lt.s32.totalorder %v354_v29, 2 }
  0xc0   : > { %v225_v2 = vclz %v448_v1  ;;  %vm256_vm10 = vcmp.eq.s32.totalorder %v251_v28, 2  ;;  %vm253_vm12 = vcmp.eq.s32.totalorder %v251_v28, 0  ;;  %vm252_vm14 = vcmp.lt.s32.totalorder %v251_v28, 2 }
  0xc2   : > { %v449_v3 = vadd.s32 4294967294, %v225_v2 }
  0xc4   : > { %vm450_vm6 = vcmp.lt.s32.totalorder %v449_v3, 0 }
  0xc5   : > { %v228_v4 = vsel %vm450_vm6, 0, %v449_v3 }
  0xc6   : > { %v229_v7 = vsub.s32 32, %v228_v4  ;;  %v233_v8 = vsub.s32 4294967266, %v228_v4  ;;  %v230_v9 = vshll.u32 %v221_v63, %v228_v4 }
  0xc8   : > { %v231_v11 = vshrl.u32 %v213_v6, %v229_v7  ;;  %v234_v12 = vadd.s32 127, %v233_v8 }
  0xca   : > { %v232_v13 = vor.u32 %v231_v11, %v230_v9  ;;  %v235_v14 = vshll.u32 %v234_v12, 23 }
  0xcc   : > { %v236_v15 = vor.u32 4788187, %v235_v14  ;;  %v239_v17 = vcvt.s32.f32 %v232_v13 }
  0xce   : > { %v237_v16 = vand.u32 2147483647, %v236_v15 }
  0xd0   : > { %v240_v18 = vmul.f32 %v239_v17, %v237_v16 }
  0xd2   : > { %v241_v19 = vxor.u32 2147483648, %v240_v18 }
  0xd4   : > { %v242_v21 = vsel %vm159_vm7, %v241_v19, %v240_v18 }
  0xd5   : > { %v245_v22 = vsel %vm158_vm8, %v655_v5, %v242_v21 }
  0xd6   : > { %510 = vcosq.f32 %v245_v22 }
  0xd7   : > { %512 = vsinq.f32 %v245_v22 }
  0xe3   : > { %v511_v30 = vpop.eup %510 }
  0xe4   : > { %v513_v10 = vpop.eup %512  ;;  %v257_v31 = vxor.u32 2147483648, %v511_v30 }
  0xe5   : > { %v254_v32 = vxor.u32 2147483648, %v513_v10 }
  0xe6   : > { %v258_v33 = vsel %vm256_vm10, %v257_v31, %v513_v10  ;;  %v361_v34 = vsel %vm359_vm11, %v257_v31, %v513_v10 }
  0xe7   : > { %v255_v35 = vsel %vm253_vm12, %v511_v30, %v254_v32  ;;  %v358_v36 = vsel %vm356_vm13, %v511_v30, %v254_v32 }
  0xe8   : > { %v259_v37 = vsel %vm252_vm14, %v255_v35, %v258_v33  ;;  %v362_v38 = vsel %vm355_vm15, %v358_v36, %v361_v34 }
  0xe9   : > { %v260_v39 = vsel %vm249_vm0, nan, %v259_v37  ;;  %v363_v40 = vsel %vm249_vm0, nan, %v362_v38 }
  0xea   : > { %v364_v41 = vsel %vm156_vm9, %v260_v39, %v363_v40 }
  0xeb   : > { %366 = vst.msk [vmem:[%s134_s3] sm:$0xff] %vm365_vm1, %v364_v41 }
  0xec   : > { %527 = shalt.err (!%p524_p3)
}
  0xed   : > { %s528_s21 = scalar_lea.hbm %s686_s7, 128  ;;  %s532_s24 = scalar_lea.hbm %s726_s2, 256 }
  0xee   : > { %p529_p4 = scmp.ne.s32.totalorder %s686_s7, %s528_s21  ;;  %p533_p9 = scmp.lt.s32.totalorder %s686_s7, %s726_s2 }
  0xef   : > { %p534_p10 = scmp.lt.s32.totalorder %s532_s24, %s528_s21 }
  0xf0   : > { %p530_p7 = pnand %p529_p4, %p637_p5 }
  0xf1   : > { %p535_p11 = por %p534_p10, %p533_p9 }
  0xf2   : > { %p531_p8 = pneg %p530_p7 }
  0xf4   : > { %p536_p12 = pnand %p535_p11, %p531_p8 }
  0xf6   : > { %539 = shalt.err (!%p536_p12)
}
  0xf7   : > { %463 = dma.vmem_to_hbm [thread:$0]  (%p637_p5), %s382_s4, 128, %s686_s7, %s368_s8  }
  0xf8 PF: > { %p469_p13 = scmp.ge.s32.totalorder %s574_s12, 2  ;;  %s393_s27 = sand.u32 1, %s562_s9  }
  0xf9   : > { %s394_s28 = scalar_lea.sflag [#allocation3], %s393_s27 }
  0xfa   : > { %p466_p0 = pnand %p469_p13, %p641_p6 }
  0xfc   : > { %p467_p1 = pneg %p466_p0 }
  0xfe   : > { %557 = dma.done.wait (%p467_p1), %s394_s28, 128  }
  0xff   : > { %559 = vsyncadd (%p467_p1), %s394_s28, 4294967168  ;;  %p12_p2 = scmp.ge.s32.totalorder %s624_s15, 4   ;;  %s729_s9 = smov %s566_s10 }
 0x100   : > { %s730_s10 = smov %s570_s11  ;;  %s731_s11 = smov %s635_s18 }
 0x101   : > { %s732_s12 = smov %s624_s15  ;;  %14 = sbr.rel (!%p12_p2) target bundleno = 3 (0x3), region = 63 }
 0x106   :  { %399 = vsyncpa [#allocation3], 1 }
 0x107   :  { %401 = vsyncpa [#allocation3 + $0x1], 1 }

</bundles_post_ra>
